<compile_context>
chip_gen: v7x
topology: tpu7x:2x2x1
jax: 0.10.0
libtpu: 0.0.40
codegen_flags: <defaults>
</compile_context>

<pallas_src>
import functools

import jax
import jax.numpy as jnp
import numpy as np
from jax import lax
from jax.experimental import pallas as pl
from jax.experimental.pallas import tpu as pltpu


def _sigmoid(t):
    # exp and the approximate reciprocal both issue on the EUP slot; the VPU stays free
    # for the big lane-dense product at the end of the kernel.
    return pl.reciprocal(1.0 + jnp.exp(-t), approx=True)


def _silu(t):
    return t * _sigmoid(t)


def _attention_kernel(x_ref, w_ref, sel_ref, o_ref, *, tb, cdim, hdim, wdim, hid):
    # x_ref / o_ref : (TB, C, H*W)  lane-dense spatial layout (H*W on the 128-lane axis)
    # w_ref         : (C, 3*hid)    packed weights [conv1.T | conv_h | conv_w], f32
    # sel_ref       : (H+W, H*W)    constant 0/1 selector rows, f32:
    #                   sel[j,   s] = (s // W == j)  for j < H   (pool / broadcast over W)
    #                   sel[H+j, s] = (s %  W == j)  for j < W   (pool / broadcast over H)
    hw = hdim * wdim
    sel = sel_ref[...]                                   # (H+W, HW) f32
    sel_h = sel[:hdim, :]                                # (H, HW)
    sel_w = sel[hdim:, :]                                # (W, HW)
    wts = w_ref[...]                                     # (C, 3*hid) f32
    inv_pool = 1.0 / float(wdim)                         # == 1/H since H == W is enforced

    # ---- Batch folded into the matmul M dimension (one dot per stage per step). ------
    xm = x_ref[...].reshape(tb * cdim, hw)               # free reshape (C % 8 == 0)

    # Pooled descriptor [x_h | x_w] for ALL tb batch elements with ONE MXU contraction over
    # the H*W lane axis; default precision, f32 accumulation.
    pooled = lax.dot_general(
        xm, sel.astype(xm.dtype), (((1,), (1,)), ((), ())),
        preferred_element_type=jnp.float32) * inv_pool   # (TB*C, H+W) f32
    pooled3 = pooled.reshape(tb, cdim, hdim + wdim)      # free split of the leading dim

    # Loop-invariant weight columns, sliced/broadcast exactly once (never re-emitted).
    w1_cols = [wts[:, o:o + 1][None] for o in range(hid)]             # (1, C, 1)
    wh_cols = [wts[:, hid + k:hid + k + 1][None] for k in range(hid)]  # (1, C, 1)
    ww_cols = [wts[:, 2 * hid + k:2 * hid + k + 1][None] for k in range(hid)]

    # Stage 1: 1x1 conv C -> hid on the fused descriptor + SiLU, batched over TB on the
    # VPU/XLU (`hid` weighted sublane reductions; a (C x hid) MXU dot would underfill it).
    ys = [_silu(jnp.sum(pooled3 * w1_cols[o], axis=1, keepdims=True))  # (TB, 1, H+W)
          for o in range(hid)]

    # Stage 2: 1x1 convs hid -> C + sigmoid as broadcasted outer-product MADs (VPU).
    a_h = _sigmoid(sum(wh_cols[k] * ys[k][:, :, :hdim] for k in range(hid)))   # (TB, C, H)
    a_w = _sigmoid(sum(ww_cols[k] * ys[k][:, :, hdim:] for k in range(hid)))   # (TB, C, W)

    # Broadcast back to (TB*C, H*W) with the same 0/1 selector: ONE pair of MXU dots for the
    # whole block (each output column has exactly one nonzero selector entry, so default
    # precision only costs the bf16 rounding of a_h / a_w).
    ah_full = jnp.dot(a_h.reshape(tb * cdim, hdim), sel_h,
                      preferred_element_type=jnp.float32)             # (TB*C, HW)
    aw_full = jnp.dot(a_w.reshape(tb * cdim, wdim), sel_w,
                      preferred_element_type=jnp.float32)             # (TB*C, HW)

    # Fully lane-dense attention product + ONE unmasked store for the whole block.
    out = (xm * ah_full * aw_full).astype(o_ref.dtype)                # promotes to f32
    o_ref[...] = out.reshape(tb, cdim, hw)


def attention_pallas(x, w1, wh, ww):
    """Coordinate-attention forward.

    x : (B, C, H, W), float32 or bfloat16 (bf16 halves HBM traffic and is the recommended
        deployment dtype; accumulation stays f32 in-kernel).
    w1: (hid, C) conv1 1x1 weight;  wh, ww: (C, hid) conv_h / conv_w 1x1 weights.
    """
    B, C, H, W = x.shape
    if H != W:
        raise ValueError(
            f"attention requires H == W (got H={H}, W={W}); the reference module's "
            "torch.cat([x_h, x_w], dim=2) only type-checks for square inputs.")
    hid = w1.shape[0]
    assert hid >= 1 and w1.shape == (hid, C) and wh.shape == (C, hid) and ww.shape == (C, hid)
    HW = H * W

    # Lane-dense HBM layout for the big tensors.
    x_flat = x.reshape(B, C, HW)

    # Pack the three 1x1-conv weights into ONE small VMEM tile: [conv1.T | conv_h | conv_w].
    wcat = jnp.concatenate([w1.T, wh, ww], axis=1).astype(jnp.float32)      # (C, 3*hid)

    # Constant 0/1 selector shared by pooling (as a mean) and broadcast-expansion.
    s = jnp.arange(HW, dtype=jnp.int32)
    rows_h = (s[None, :] // W == jnp.arange(H, dtype=jnp.int32)[:, None])   # (H, HW)
    rows_w = (s[None, :] % W == jnp.arange(W, dtype=jnp.int32)[:, None])    # (W, HW)
    sel = jnp.concatenate([rows_h, rows_w], axis=0).astype(jnp.float32)     # (H+W, HW)

    # ---- Batch-block (TB) selection ---------------------------------------------------
    #  * target ~8 MiB of input per grid step (amortizes ~0.35 us/step; 2 double-buffered
    #    input blocks + 2 output blocks + consts stay under ~40 MiB -> safe on v7x 64 MiB),
    #  * keep >= ~8 grid steps when B permits (both v7x TensorCores get several pipelined
    #    steps); for small B prefer tb=1 over tb=B so the grid never has a single step.
    bytes_per_b = C * HW * x.dtype.itemsize
    cap_vmem = max(1, (8 << 20) // max(1, bytes_per_b))
    cap_grid = max(1, B // 8)
    cap = max(1, min(B, cap_vmem, cap_grid))
    tb = 1
    for cand in range(cap, 0, -1):
        if B % cand == 0:
            tb = cand
            break
    grid = (B // tb,)

    block_bytes = tb * bytes_per_b
    const_bytes = sel.size * 4 + wcat.size * 4
    # 2 double-buffered input + 2 output blocks + consts + slack; capped well below v7x's
    # 64 MiB physical VMEM to leave Mosaic internal-scratch headroom.
    vmem_limit = int(max(32 << 20, min(48 << 20, 4 * block_bytes + const_bytes + (4 << 20))))

    kernel = functools.partial(_attention_kernel, tb=tb, cdim=C, hdim=H, wdim=W, hid=hid)
    out_flat = pl.pallas_call(
        kernel,
        out_shape=jax.ShapeDtypeStruct((B, C, HW), x.dtype),
        grid=grid,
        in_specs=[
            pl.BlockSpec((tb, C, HW), lambda i: (i, 0, 0)),
            pl.BlockSpec((C, 3 * hid), lambda i: (0, 0)),
            pl.BlockSpec((H + W, HW), lambda i: (0, 0)),
        ],
        out_specs=pl.BlockSpec((tb, C, HW), lambda i: (i, 0, 0)),
        compiler_params=pltpu.CompilerParams(
            dimension_semantics=("parallel",),
            vmem_limit_bytes=vmem_limit,
        ),
    )(x_flat, wcat, sel)
    return out_flat.reshape(B, C, H, W)


def attention_reference(x, w1, wh, ww):
    """Float64 NumPy reference matching the PyTorch forward semantics exactly."""
    x = np.asarray(x).astype(np.float64)
    w1 = np.asarray(w1).astype(np.float64)
    wh = np.asarray(wh).astype(np.float64)
    ww = np.asarray(ww).astype(np.float64)
    B, C, H, W = x.shape
    x_h = x.mean(axis=3)                                        # (B, C, H)  pool over W
    x_w = x.mean(axis=2)                                        # (B, C, W)  pool over H
    p = np.concatenate([x_h, x_w], axis=2)                      # (B, C, H+W)
    z = np.einsum("oc,bcs->bos", w1, p)                         # conv1 (1x1, no bias)
    y = z / (1.0 + np.exp(-z))                                  # SiLU
    a_h = 1.0 / (1.0 + np.exp(-np.einsum("co,boh->bch", wh, y[:, :, :H])))
    a_w = 1.0 / (1.0 + np.exp(-np.einsum("co,bow->bcw", ww, y[:, :, H:])))
    return x * a_h[:, :, :, None] * a_w[:, :, None, :]


if __name__ == "__main__":
    # in_channels=32, reduction=16 (module default) -> hidden_channels=2
    B, C, H, W = 2, 32, 16, 16
    reduction = 16
    hid = C // reduction

    key = jax.random.PRNGKey(0)
    kx, k1, kh, kw = jax.random.split(key, 4)

    x = jax.random.normal(kx, (B, C, H, W), dtype=jnp.float32)
    # 1x1 conv weights (kernel_size=1, bias=False) -> plain (out, in) matrices.
    w1 = jax.random.normal(k1, (hid, C), dtype=jnp.float32) * (1.0 / np.sqrt(C))
    wh = jax.random.normal(kh, (C, hid), dtype=jnp.float32) * (1.0 / np.sqrt(hid))
    ww = jax.random.normal(kw, (C, hid), dtype=jnp.float32) * (1.0 / np.sqrt(hid))

    # ---- float32 I/O path (default-precision MXU dots; tolerance covers bf16 rounding
    #      of x in the pooling dot and of a_h/a_w in the expansion dots + approx-recip). --
    out_f32 = attention_pallas(x, w1, wh, ww)
    jax.block_until_ready(out_f32)
    ref = attention_reference(x, w1, wh, ww)
    np.testing.assert_allclose(np.asarray(out_f32).astype(np.float64), ref,
                               rtol=1e-2, atol=1e-2)

    # ---- bfloat16 I/O path (perf-recommended deployment dtype: halves HBM bytes). ------
    x_bf16 = x.astype(jnp.bfloat16)
    out_bf16 = attention_pallas(x_bf16, w1, wh, ww)
    jax.block_until_ready(out_bf16)
    ref_bf16 = attention_reference(np.asarray(x_bf16).astype(np.float32), w1, wh, ww)
    np.testing.assert_allclose(np.asarray(out_bf16).astype(np.float64), ref_bf16,
                               rtol=2e-2, atol=2e-2)

    print("KERNEL_OK")
</pallas_src>

<mosaic_0001>
module attributes {stable_mosaic.version = 11 : i64} {
  func.func @_attention_kernel(%arg0: i32, %arg1: memref<1x32x256xf32, #tpu.memory_space<vmem>>, %arg2: memref<32x6xf32, #tpu.memory_space<vmem>>, %arg3: memref<32x256xf32, #tpu.memory_space<vmem>>, %arg4: memref<1x32x256xf32, #tpu.memory_space<vmem>>) attributes {dimension_semantics = [#tpu.dimension_semantics<parallel>], iteration_bounds = array<i64: 2>, scalar_prefetch = 0 : i64, scratch_operands = 0 : i64, tpu.core_type = #tpu.core_type<tc>, window_params = [{transform_indices = @transform_0, window_bounds = array<i64: 1, 32, 256>}, {pipeline_mode = #tpu.pipeline_mode<synchronous>, transform_indices = @transform_1, window_bounds = array<i64: 32, 6>}, {pipeline_mode = #tpu.pipeline_mode<synchronous>, transform_indices = @transform_2, window_bounds = array<i64: 32, 256>}, {transform_indices = @transform_3, window_bounds = array<i64: 1, 32, 256>}]} {
    %c0 = arith.constant 0 : index
    %c0_0 = arith.constant 0 : index
    %0 = vector.load %arg3[%c0, %c0_0] : memref<32x256xf32, #tpu.memory_space<vmem>>, vector<32x256xf32>
    %1 = vector.extract_strided_slice %0 {offsets = [0, 0], sizes = [16, 256], strides = [1, 1]} : vector<32x256xf32> to vector<16x256xf32>
    %2 = vector.extract_strided_slice %0 {offsets = [16, 0], sizes = [16, 256], strides = [1, 1]} : vector<32x256xf32> to vector<16x256xf32>
    %c0_1 = arith.constant 0 : index
    %c0_2 = arith.constant 0 : index
    %3 = vector.load %arg2[%c0_1, %c0_2] : memref<32x6xf32, #tpu.memory_space<vmem>>, vector<32x6xf32>
    %c0_3 = arith.constant 0 : index
    %c0_4 = arith.constant 0 : index
    %c0_5 = arith.constant 0 : index
    %4 = vector.load %arg1[%c0_3, %c0_4, %c0_5] : memref<1x32x256xf32, #tpu.memory_space<vmem>>, vector<1x32x256xf32>
    %5 = vector.shape_cast %4 : vector<1x32x256xf32> to vector<32x256xf32>
    %cst = arith.constant dense<0.000000e+00> : vector<32x32xf32>
    %6 = tpu.matmul %5, %0, %cst {dimension_numbers = #tpu.dot_dimension_numbers<[1], [1], [0], [0], [0, 0, 1, 0], [], []>} : vector<32x256xf32>, vector<32x256xf32>, vector<32x32xf32> -> vector<32x32xf32>
    %cst_6 = arith.constant 6.250000e-02 : f32
    %7 = vector.broadcast %cst_6 : f32 to vector<32x32xf32>
    %8 = arith.mulf %6, %7 : vector<32x32xf32>
    %9 = vector.shape_cast %8 : vector<32x32xf32> to vector<1x32x32xf32>
    %10 = vector.extract_strided_slice %3 {offsets = [0, 0], sizes = [32, 1], strides = [1, 1]} : vector<32x6xf32> to vector<32x1xf32>
    %11 = vector.shape_cast %10 : vector<32x1xf32> to vector<1x32x1xf32>
    %12 = vector.extract_strided_slice %3 {offsets = [0, 1], sizes = [32, 1], strides = [1, 1]} : vector<32x6xf32> to vector<32x1xf32>
    %13 = vector.shape_cast %12 : vector<32x1xf32> to vector<1x32x1xf32>
    %14 = vector.extract_strided_slice %3 {offsets = [0, 2], sizes = [32, 1], strides = [1, 1]} : vector<32x6xf32> to vector<32x1xf32>
    %15 = vector.shape_cast %14 : vector<32x1xf32> to vector<1x32x1xf32>
    %16 = vector.extract_strided_slice %3 {offsets = [0, 3], sizes = [32, 1], strides = [1, 1]} : vector<32x6xf32> to vector<32x1xf32>
    %17 = vector.shape_cast %16 : vector<32x1xf32> to vector<1x32x1xf32>
    %18 = vector.extract_strided_slice %3 {offsets = [0, 4], sizes = [32, 1], strides = [1, 1]} : vector<32x6xf32> to vector<32x1xf32>
    %19 = vector.shape_cast %18 : vector<32x1xf32> to vector<1x32x1xf32>
    %20 = vector.extract_strided_slice %3 {offsets = [0, 5], sizes = [32, 1], strides = [1, 1]} : vector<32x6xf32> to vector<32x1xf32>
    %21 = vector.shape_cast %20 : vector<32x1xf32> to vector<1x32x1xf32>
    %22 = vector.broadcast %11 : vector<1x32x1xf32> to vector<1x32x32xf32>
    %23 = arith.mulf %9, %22 : vector<1x32x32xf32>
    %cst_7 = arith.constant dense<0.000000e+00> : vector<1x32xf32>
    %24 = vector.multi_reduction <add>, %23, %cst_7 [1] : vector<1x32x32xf32> to vector<1x32xf32>
    %25 = vector.shape_cast %24 : vector<1x32xf32> to vector<1x1x32xf32>
    %cst_8 = arith.constant 0.000000e+00 : f32
    %26 = vector.broadcast %cst_8 : f32 to vector<1x1x32xf32>
    %27 = arith.subf %26, %25 : vector<1x1x32xf32>
    %28 = math.exp %27 : vector<1x1x32xf32>
    %cst_9 = arith.constant 1.000000e+00 : f32
    %29 = vector.broadcast %cst_9 : f32 to vector<1x1x32xf32>
    %30 = arith.addf %29, %28 : vector<1x1x32xf32>
    %31 = tpu.reciprocal %30 {approx = true} : vector<1x1x32xf32> -> vector<1x1x32xf32>
    %32 = arith.mulf %25, %31 : vector<1x1x32xf32>
    %33 = vector.broadcast %13 : vector<1x32x1xf32> to vector<1x32x32xf32>
    %34 = arith.mulf %9, %33 : vector<1x32x32xf32>
    %cst_10 = arith.constant dense<0.000000e+00> : vector<1x32xf32>
    %35 = vector.multi_reduction <add>, %34, %cst_10 [1] : vector<1x32x32xf32> to vector<1x32xf32>
    %36 = vector.shape_cast %35 : vector<1x32xf32> to vector<1x1x32xf32>
    %cst_11 = arith.constant 0.000000e+00 : f32
    %37 = vector.broadcast %cst_11 : f32 to vector<1x1x32xf32>
    %38 = arith.subf %37, %36 : vector<1x1x32xf32>
    %39 = math.exp %38 : vector<1x1x32xf32>
    %cst_12 = arith.constant 1.000000e+00 : f32
    %40 = vector.broadcast %cst_12 : f32 to vector<1x1x32xf32>
    %41 = arith.addf %40, %39 : vector<1x1x32xf32>
    %42 = tpu.reciprocal %41 {approx = true} : vector<1x1x32xf32> -> vector<1x1x32xf32>
    %43 = arith.mulf %36, %42 : vector<1x1x32xf32>
    %44 = vector.extract_strided_slice %32 {offsets = [0, 0, 0], sizes = [1, 1, 16], strides = [1, 1, 1]} : vector<1x1x32xf32> to vector<1x1x16xf32>
    %45 = vector.broadcast %15 : vector<1x32x1xf32> to vector<1x32x16xf32>
    %46 = vector.broadcast %44 : vector<1x1x16xf32> to vector<1x32x16xf32>
    %47 = arith.mulf %45, %46 : vector<1x32x16xf32>
    %cst_13 = arith.constant 0.000000e+00 : f32
    %48 = vector.broadcast %cst_13 : f32 to vector<1x32x16xf32>
    %49 = arith.addf %48, %47 : vector<1x32x16xf32>
    %50 = vector.extract_strided_slice %43 {offsets = [0, 0, 0], sizes = [1, 1, 16], strides = [1, 1, 1]} : vector<1x1x32xf32> to vector<1x1x16xf32>
    %51 = vector.broadcast %17 : vector<1x32x1xf32> to vector<1x32x16xf32>
    %52 = vector.broadcast %50 : vector<1x1x16xf32> to vector<1x32x16xf32>
    %53 = arith.mulf %51, %52 : vector<1x32x16xf32>
    %54 = arith.addf %49, %53 : vector<1x32x16xf32>
    %cst_14 = arith.constant 0.000000e+00 : f32
    %55 = vector.broadcast %cst_14 : f32 to vector<1x32x16xf32>
    %56 = arith.subf %55, %54 : vector<1x32x16xf32>
    %57 = math.exp %56 : vector<1x32x16xf32>
    %cst_15 = arith.constant 1.000000e+00 : f32
    %58 = vector.broadcast %cst_15 : f32 to vector<1x32x16xf32>
    %59 = arith.addf %58, %57 : vector<1x32x16xf32>
    %60 = tpu.reciprocal %59 {approx = true} : vector<1x32x16xf32> -> vector<1x32x16xf32>
    %61 = vector.extract_strided_slice %32 {offsets = [0, 0, 16], sizes = [1, 1, 16], strides = [1, 1, 1]} : vector<1x1x32xf32> to vector<1x1x16xf32>
    %62 = vector.broadcast %19 : vector<1x32x1xf32> to vector<1x32x16xf32>
    %63 = vector.broadcast %61 : vector<1x1x16xf32> to vector<1x32x16xf32>
    %64 = arith.mulf %62, %63 : vector<1x32x16xf32>
    %cst_16 = arith.constant 0.000000e+00 : f32
    %65 = vector.broadcast %cst_16 : f32 to vector<1x32x16xf32>
    %66 = arith.addf %65, %64 : vector<1x32x16xf32>
    %67 = vector.extract_strided_slice %43 {offsets = [0, 0, 16], sizes = [1, 1, 16], strides = [1, 1, 1]} : vector<1x1x32xf32> to vector<1x1x16xf32>
    %68 = vector.broadcast %21 : vector<1x32x1xf32> to vector<1x32x16xf32>
    %69 = vector.broadcast %67 : vector<1x1x16xf32> to vector<1x32x16xf32>
    %70 = arith.mulf %68, %69 : vector<1x32x16xf32>
    %71 = arith.addf %66, %70 : vector<1x32x16xf32>
    %cst_17 = arith.constant 0.000000e+00 : f32
    %72 = vector.broadcast %cst_17 : f32 to vector<1x32x16xf32>
    %73 = arith.subf %72, %71 : vector<1x32x16xf32>
    %74 = math.exp %73 : vector<1x32x16xf32>
    %cst_18 = arith.constant 1.000000e+00 : f32
    %75 = vector.broadcast %cst_18 : f32 to vector<1x32x16xf32>
    %76 = arith.addf %75, %74 : vector<1x32x16xf32>
    %77 = tpu.reciprocal %76 {approx = true} : vector<1x32x16xf32> -> vector<1x32x16xf32>
    %78 = vector.shape_cast %60 : vector<1x32x16xf32> to vector<32x16xf32>
    %cst_19 = arith.constant dense<0.000000e+00> : vector<32x256xf32>
    %79 = tpu.matmul %78, %1, %cst_19 {dimension_numbers = #tpu.dot_dimension_numbers<[1], [0], [0], [1], [0, 0, 1, 1], [], []>} : vector<32x16xf32>, vector<16x256xf32>, vector<32x256xf32> -> vector<32x256xf32>
    %80 = vector.shape_cast %77 : vector<1x32x16xf32> to vector<32x16xf32>
    %cst_20 = arith.constant dense<0.000000e+00> : vector<32x256xf32>
    %81 = tpu.matmul %80, %2, %cst_20 {dimension_numbers = #tpu.dot_dimension_numbers<[1], [0], [0], [1], [0, 0, 1, 1], [], []>} : vector<32x16xf32>, vector<16x256xf32>, vector<32x256xf32> -> vector<32x256xf32>
    %82 = arith.mulf %5, %79 : vector<32x256xf32>
    %83 = arith.mulf %82, %81 : vector<32x256xf32>
    %84 = vector.shape_cast %83 : vector<32x256xf32> to vector<1x32x256xf32>
    %c0_21 = arith.constant 0 : index
    %c0_22 = arith.constant 0 : index
    %c0_23 = arith.constant 0 : index
    %85 = vector.load %arg4[%c0_21, %c0_22, %c0_23] : memref<1x32x256xf32, #tpu.memory_space<vmem>>, vector<1x32x256xf32>
    tpu.vector_store %arg4[%c0_21, %c0_22, %c0_23], %84 {strides = array<i32>} : memref<1x32x256xf32, #tpu.memory_space<vmem>>, vector<1x32x256xf32>,
    return
  }
  func.func @transform_0(%arg0: i32) -> (i32, i32, i32) {
    %c0_i32 = arith.constant 0 : i32
    %c0_i32_0 = arith.constant 0 : i32
    %c0_i32_1 = arith.constant 0 : i32
    return %arg0, %c0_i32, %c0_i32_0 : i32, i32, i32
  }
  func.func @transform_1(%arg0: i32) -> (i32, i32) {
    %c0_i32 = arith.constant 0 : i32
    %c0_i32_0 = arith.constant 0 : i32
    %c0_i32_1 = arith.constant 0 : i32
    return %c0_i32, %c0_i32_0 : i32, i32
  }
  func.func @transform_2(%arg0: i32) -> (i32, i32) {
    %c0_i32 = arith.constant 0 : i32
    %c0_i32_0 = arith.constant 0 : i32
    %c0_i32_1 = arith.constant 0 : i32
    return %c0_i32, %c0_i32_0 : i32, i32
  }
  func.func @transform_3(%arg0: i32) -> (i32, i32, i32) {
    %c0_i32 = arith.constant 0 : i32
    %c0_i32_0 = arith.constant 0 : i32
    %c0_i32_1 = arith.constant 0 : i32
    return %arg0, %c0_i32, %c0_i32_0 : i32, i32, i32
  }
}

</mosaic_0001>

<bundles_post_ra>
// kernel: tpu_custom_call.1
= control target key start
LH: loop header
LB: loop body
LE: loop exit
PB: predicated region body
PF: predicated region fallthrough
CT: control target
= control target key end

     0   :  { %8 = vsyncpa [#allocation3], 0  ;;  %s1488_s0 = inlined_call_operand.hbm [shape: f32[2,32,256], index: 0, kind: input, shape index: {}]   ;;  %s1489_s1 = inlined_call_operand.vmem [shape: f32[32,6], index: 1, kind: input, shape index: {}]   ;;  %s1490_s2 = inlined_call_operand.hbm [shape: f32[32,256], index: 2, kind: input, shape index: {}]   ;;  %s1491_s3 = inlined_call_operand.hbm [shape: f32[2,32,256], index: 3, kind: output, shape index: {}]  }
   0x1   :  { %10 = vsyncpa [#allocation3 + $0x1], 0 }
   0x2   :  { %11 = vsyncpa [#allocation6], 0 }
   0x3   :  { %12 = vsyncpa [#allocation4], 0 }
   0x4   :  { %14 = vsyncpa [#allocation4 + $0x1], 0  ;;  %s1195_s12 = smov 0   ;;  %s1197_s13 = smov 0  }
   0x5   :  { %s1199_s14 = smov 0   ;;  %s1201_s15 = smov 0  }
   0x6 LB: > { %s1216_s16 = sadd.s32 4294967295, %s1158_s15   ;;  %s864_s17 = sadd.s32 4294967294, %s1158_s15   ;;  %s1158_s15 = sphi %s1201_s15, %s1511_s15   ;;  %s1154_s14 = sphi %s1199_s14, %s1510_s14   ;;  %s1150_s13 = sphi %s1197_s13, %s1509_s13   ;;  %s1146_s12 = sphi %s1195_s12, %s1508_s12  }
   0x7   : > { %p40_p0 = scmp.ne.s32.totalorder %s1150_s13, %s1146_s12  ;;  %p1492_p1 = scmp.eq.s32.totalorder %s1216_s16, 0 }
   0x8   : > { %p112_p3 = scmp.eq.s32.totalorder %s864_s17, 1  ;;  %p865_p5 = scmp.ge.s32.totalorder %s1158_s15, 1 }
   0x9   : > { %p1225_p4 = por %p1492_p1, %p40_p0  ;;  %p119_p7 = scmp.lt.s32.totalorder %s1158_s15, 3 }
   0xa   : > { %p1230_p6 = por %p112_p3, %p40_p0  ;;  %s1160_s21 = smov [#allocation5]  }
   0xb   : > { %s1495_s18 = scalar_select %p1225_p4, 1, 0 }
   0xc   : > { %s1496_s19 = scalar_select %p1230_p6, 1, 0 }
   0xd   : > { %p1235_p8 = pnand %p865_p5, %p119_p7  ;;  %s134_s22 = sshll.u32 %s1160_s21, 4  ;;  %s1239_s22 = int_to_ptr.vmem [resolvable:$true] %s134_s22 }
   0xe   : > { %s1251_s24 = sadd.s32 1, %s1158_s15   ;;  %s27_s25 = sadd.s32 1, %s1154_s14 }
   0xf   : > { %s1497_s20 = scalar_select %p1235_p8, 1, 0 }
  0x10   : > { %p914_p9 = pneg %p1235_p8  ;;  %s24_s26 = ssub.s32 %s1158_s15, %s1251_s24 }
  0x11   : > { %s1030_s29 = scalar_lea.hbm %s1490_s2, 1024 }
  0x12   : > { %p1246_p11 = pnand %p914_p9, %p1492_p1  ;;  %p1031_p12 = scmp.ne.s32.totalorder %s1490_s2, %s1030_s29 }
  0x13   : > { %p1037_p5 = scmp.lt.u32.totalorder %s1030_s29, %s1490_s2 }
  0x14   : > { %p1032_p13 = pneg %p1246_p11 }
  0x16   : > { %p1033_p0 = pnand %p1032_p13, %p1031_p12 }
  0x18   : > { %p1034_p3 = pneg %p1033_p0 }
  0x1a   : > { %p1039_p7 = pnand %p1037_p5, %p1034_p3 }
  0x1c   : > { %1042 = shalt.err (!%p1039_p7)
}
  0x1d   : > { %s1043_s7 = scalar_lea.vmem %s1239_s22, 1024  ;;  %p1051_p2 = scmp.lt.s32.totalorder %s1239_s22, %s1239_s22 }
  0x1e   : > { %p1044_p9 = scmp.ne.s32.totalorder %s1239_s22, %s1043_s7  ;;  %p1052_p6 = scmp.lt.s32.totalorder %s1043_s7, %s1043_s7 }
  0x20   : > { %p1046_p10 = pnand %p1044_p9, %p1032_p13  ;;  %p1053_p4 = por %p1052_p6, %p1051_p2 }
  0x22   : > { %p1047_p1 = pneg %p1046_p10 }
  0x24   : > { %p1054_p8 = pnand %p1053_p4, %p1047_p1 }
  0x26   : > { %1057 = shalt.err (!%p1054_p8)
}
  0x27   : > { %s1161_s8 = smov 256   ;;  %s1162_s9 = smov 16  }
  0x28   : > { %917 = dma.hbm_to_vmem [thread:$0]  (!%p1246_p11), %s1490_s2, 1024, %s1239_s22, [#allocation6], %s1161_s8, %s1161_s8, %s1162_s9  }
  0x29   : > { %p25_p1 = scmp.eq.s32.totalorder %s24_s26, 0  ;;  %p34_p2 = scmp.ne.s32.totalorder %s1154_s14, %s1150_s13 }
  0x2a   : > { %p35_p4 = scmp.eq.s32.totalorder %s1158_s15, 0  ;;  %p927_p6 = scmp.lt.s32.totalorder %s1158_s15, 2 }
  0x2b   : > { %s1285_s17 = scalar_select %p25_p1, %s1154_s14, %s27_s25  }
  0x2c   : > { %p36_p8 = por %p35_p4, %p34_p2  ;;  %p1499_p10 = scmp.eq.s32.totalorder %s1216_s16, 1 }
  0x2d   : > { %s148_s23 = sand.u32 1, %s1154_s14   ;;  %s888_s27 = sshll.u32 %s1158_s15, 10 }
  0x2e   : > { %p1289_p12 = por %p1499_p10, %p34_p2  ;;  %s868_s28 = sshll.u32 %s148_s23, 6 }
  0x2f   : > { %s1298_s4 = scalar_lea.hbm %s1488_s0, %s888_s27  ;;  %s152_s22 = scalar_lea.vmem [#allocation2], %s868_s28 }
  0x30   : > { %s159_s25 = sshll.u32 %s152_s22, 4  ;;  %p1300_p11 = pnand %p927_p6, %p36_p8  ;;  %s1304_s25 = int_to_ptr.vmem [resolvable:$true] %s159_s25 }
  0x31   : > { %s1306_s5 = scalar_lea.sflag [#allocation3], %s148_s23  ;;  %s1058_s6 = scalar_lea.hbm %s1298_s4, 1024 }
  0x32   : > { %p1059_p13 = scmp.ne.s32.totalorder %s1298_s4, %s1058_s6  ;;  %p1060_p0 = pneg %p1300_p11 }
  0x33   : > { %s1063_s11 = scalar_lea.hbm %s1488_s0, 2048  ;;  %p1064_p7 = scmp.lt.u32.totalorder %s1298_s4, %s1488_s0 }
  0x34   : > { %p1061_p3 = pnand %p1060_p0, %p1059_p13  ;;  %p1065_p9 = scmp.lt.u32.totalorder %s1063_s11, %s1058_s6 }
  0x35   : > { %p1067_p2 = scmp.lt.u32.totalorder %s1058_s6, %s1298_s4 }
  0x36   : > { %p1062_p5 = pneg %p1061_p3  ;;  %p1066_p1 = por %p1065_p9, %p1064_p7 }
  0x38   : > { %p1068_p4 = por %p1067_p2, %p1066_p1 }
  0x3a   : > { %p1069_p6 = pnand %p1068_p4, %p1062_p5 }
  0x3c   : > { %1072 = shalt.err (!%p1069_p6)
}
  0x3d   : > { %s1073_s23 = scalar_lea.vmem %s1304_s25, 1024  ;;  %s1163_s29 = smov [#allocation2]  }
  0x3e   : > { %p1074_p8 = scmp.ne.s32.totalorder %s1304_s25, %s1073_s23  ;;  %s1078_s30 = sshll.u32 %s1163_s29, 4  ;;  %s1079_s30 = int_to_ptr.vmem [resolvable:$false] %s1078_s30 }
  0x3f   : > { %s1080_s22 = scalar_lea.vmem %s1079_s30, 2048  ;;  %p1081_p3 = scmp.lt.s32.totalorder %s1304_s25, %s1079_s30 }
  0x40   : > { %p1076_p10 = pnand %p1074_p8, %p1060_p0  ;;  %p1082_p7 = scmp.lt.s32.totalorder %s1080_s22, %s1073_s23 }
  0x42   : > { %p1077_p13 = pneg %p1076_p10  ;;  %p1083_p9 = por %p1082_p7, %p1081_p3 }
  0x44   : > { %p1084_p1 = pnand %p1083_p9, %p1077_p13 }
  0x46   : > { %1087 = shalt.err (!%p1084_p1)
}
  0x47   : > { %921 = dma.hbm_to_vmem [thread:$0]  (!%p1300_p11), %s1298_s4, 1024, %s1304_s25, %s1306_s5, %s1161_s8, %s1161_s8, %s1162_s9  }
  0x48   : > { %p1502_p0 = scmp.ne.s32.totalorder %s1497_s20, 0 }
  0x49   : > { %s1340_s6 = sand.u32 (!%p1502_p0), 1, %s1150_s13   ;;  %p1503_p5 = scmp.ne.s32.totalorder (!%p1502_p0), %s1495_s18, 0 }
  0x4a   : > { %171 = sbr.rel (%p1502_p0) target bundleno = 768 (0x300), region = 32  ;;  %s872_s7 = sshll.u32 (!%p1502_p0), %s1340_s6, 6 }
  0x4b   : > { %s174_s10 = scalar_lea.sflag (!%p1502_p0), [#allocation3], %s1340_s6  ;;  %s1346_s26 = scalar_lea.vmem (!%p1502_p0), [#allocation2], %s872_s7 }
  0x51   : > { %1133 = dma.done.wait (%p1503_p5), %s174_s10, 1024  }
  0x52   : > { %1135 = vsyncadd (%p1503_p5), %s174_s10, 4294966272  ;;  %p1504_p11 = scmp.eq.s32.totalorder %s1216_s16, 0 }
  0x54   : > { %1137 = dma.done.wait (%p1504_p11), [#allocation6], 1024   ;;  %p1505_p2 = pmov %p1504_p11 }
  0x55   : > { %v1164_v0 = vmov 1   ;;  %v1165_v1 = vmov 0   ;;  %v205_v2 = vld [vmem:[#allocation5 + $0x8] sm:$0xff]  ;;  %v207_v3 = vld [vmem:[#allocation5 + $0x18] sm:$0xff]  ;;  %v204_v4 = vld [vmem:[#allocation5] sm:$0xff]  ;;  %v1166_v23 = vmov 5  }
  0x56   : > { %1139 = vsyncadd (%p1505_p2), [#allocation6], 4294966272  ;;  %976 = vset.pattern.permute.xlu1 %v1164_v0  ;;  %975 = vset.pattern.permute.xlu0 %v1165_v1  ;;  %v890_v5 = vpack.c.bf16 %v207_v3, %v205_v2  ;;  %v206_v6 = vld [vmem:[#allocation5 + $0x10] sm:$0xff]  ;;  %v209_v7 = vld [vmem:[#allocation5 + $0x28] sm:$0xff]  ;;  %v1167_v24 = vmov 4   ;;  %v1168_v28 = vmov 3  }
  0x57   : > { %v211_v8 = vld [vmem:[#allocation5 + $0x38] sm:$0xff]  ;;  %v892_v9 = vpack.c.bf16 %v206_v6, %v204_v4  ;;  %v1357_v11 = vld [vmem:[%s1346_s26 + $0x8] sm:$0xff]  ;;  %v208_v12 = vld [vmem:[#allocation5 + $0x20] sm:$0xff]  ;;  %v1169_v29 = vmov 2   ;;  %v1170_v30 = vmov 0.0   ;;  %vm337_vm0 = vcmask 261120  }
  0x58   : > { %v894_v10 = vpack.c.bf16 %v211_v8, %v209_v7  ;;  %891 = vmatprep.subr.bf16.mxu0 %v890_v5  ;;  %288 = vmatprep.mubr.f32.mxu0 %v1357_v11  ;;  %v210_v13 = vld [vmem:[#allocation5 + $0x30] sm:$0xff]  ;;  %v212_v14 = vld [vmem:[%s1489_s1] sm:$0xff]  ;;  %v213_v15 = vld [vmem:[%s1489_s1 + $0x8] sm:$0xff]  ;;  %s1171_s27 = smov 112   ;;  %vm532_vm1 = vcmask 130048   ;;  %s203_s28 = scalar_lea.vmem [#allocation7], %s872_s7 }
  0x59   : > { %893 = vmatpush1.bf16.xpose.msra.mxu0 %v892_v9  ;;  %899 = vmatprep.subr.bf16.mxu1 %v890_v5  ;;  %v1366_v16 = vpack.c.bf16 %v210_v13, %v208_v12  ;;  %v214_v17 = vld [vmem:[%s1489_s1 + $0x10] sm:$0xff]  ;;  %v215_v18 = vld [vmem:[%s1489_s1 + $0x18] sm:$0xff]  ;;  %v1376_v19 = vld [vmem:[%s1346_s26] sm:$0xff]  ;;  %s781_s23 = sshll.u32 %s203_s28, 4  ;;  %s889_s29 = sshll.u32 %s1216_s16, 10  ;;  %s1439_s23 = int_to_ptr.vmem [resolvable:$true] %s781_s23 }
  0x5a   : > { %895 = vmatprep.subr.bf16.mxu0 %v894_v10  ;;  %901 = vmatpush1.bf16.msra.mxu1 %v892_v9  ;;  %v1379_v20 = vld [vmem:[%s1346_s26 + $0x18] sm:$0xff]  ;;  %v1384_v21 = vld [vmem:[%s1346_s26 + $0x10] sm:$0xff]  ;;  %v1387_v22 = vld [vmem:[%s1346_s26 + $0x28] sm:$0xff]  ;;  %s1444_s7 = scalar_lea.hbm %s1491_s3, %s889_s29  ;;  %s768_s16 = scalar_lea.sflag [#allocation4], %s1340_s6 }
  0x5b   : > { %358 = vperm.xlu1 %976, %v212_v14   ;;  %315 = vperm.xlu0 %975, %v212_v14   ;;  %v1392_v25 = vld [vmem:[%s1346_s26 + $0x20] sm:$0xff]  ;;  %v1395_v26 = vld [vmem:[%s1346_s26 + $0x38] sm:$0xff]  ;;  %v1400_v27 = vld [vmem:[%s1346_s26 + $0x30] sm:$0xff]  ;;  %s1088_s10 = scalar_lea.vmem %s1439_s23, 1024  ;;  %s1172_s26 = smov [#allocation7]  }
  0x5c   : > { %903 = vmatprep.subr.bf16.mxu1 %v894_v10  ;;  %609 = vmatprep.mubr.f32.mxu1 %v1170_v30  ;;  %p1089_p4 = scmp.ne.s32.totalorder %s1439_s23, %s1088_s10  ;;  %s1092_s18 = sshll.u32 %s1172_s26, 4  ;;  %s1093_s18 = int_to_ptr.vmem [resolvable:$false] %s1092_s18 }
  0x5d   : > { %s1094_s20 = scalar_lea.vmem %s1093_s18, 2048  ;;  %p1095_p10 = scmp.lt.s32.totalorder %s1439_s23, %s1093_s18 }
  0x5e   : > { %p1090_p6 = pnand %p1089_p4, %p1289_p12  ;;  %p1096_p13 = scmp.lt.s32.totalorder %s1094_s20, %s1088_s10 }
  0x5f   : > { %362 = vperm.xlu1 %976, %v213_v15   ;;  %320 = vperm.xlu0 %975, %v213_v15  }
  0x60   : > { %p1091_p8 = pneg %p1090_p6  ;;  %p1097_p3 = por %p1096_p13, %p1095_p10 }
  0x61   : > { %897 = vmatpush1.bf16.xpose.msra.mxu0 %v1366_v16 }
  0x62   : > { %p1098_p7 = pnand %p1097_p3, %p1091_p8 }
  0x63   : > { %366 = vperm.xlu1 %976, %v214_v17   ;;  %325 = vperm.xlu0 %975, %v214_v17  }
  0x67   : > { %370 = vperm.xlu1 %976, %v215_v18   ;;  %330 = vperm.xlu0 %975, %v215_v18  }
  0x68   : > { %289 = vmatmul.mubr.f32.vlgmr.msra.gmra.mrb[0].mxu0 %v1376_v19 }
  0x69   : > { %293 = vmatprep.mubr.f32.mxu0 %v1379_v20 }
  0x6b   : > { %978 = vset.pattern.permute.xlu1 %v1166_v23  ;;  %977 = vset.pattern.permute.xlu0 %v1167_v24 }
  0x6c   : > { %294 = vmatmul.mubr.f32.gmra.mrb[2].mxu0 %v1384_v21  ;;  %489 = vperm.xlu1 %978, %v212_v14  }
  0x6d   : > { %298 = vmatprep.mubr.f32.mxu0 %v1387_v22  ;;  %465 = vperm.xlu0 %977, %v212_v14  }
  0x70   : > { %299 = vmatmul.mubr.f32.gmra.mrb[4].mxu0 %v1392_v25  ;;  %979 = vset.pattern.permute.xlu1 %v1167_v24 }
  0x71   : > { %303 = vmatprep.mubr.f32.mxu0 %v1395_v26  ;;  %469 = vperm.xlu1 %979, %v213_v15  }
  0x72   : > { %980 = vset.pattern.permute.xlu0 %v1166_v23 }
  0x73   : > { %493 = vperm.xlu0 %980, %v213_v15  }
  0x74   : > { %304 = vmatmul.mubr.f32.gmra.mrb[6].mxu0 %v1400_v27 }
  0x75   : > { %473 = vperm.xlu1 %979, %v214_v17  }
  0x77   : > { %982 = vset.pattern.permute.xlu0 %v1167_v24 }
  0x78   : > { %477 = vperm.xlu0 %982, %v215_v18  }
  0x79   : > { %981 = vset.pattern.permute.xlu1 %v1166_v23 }
  0x7a   : > { %497 = vperm.xlu1 %981, %v214_v17  }
  0x7c   : > { %984 = vset.pattern.permute.xlu0 %v1168_v28 }
  0x7d   : > { %421 = vperm.xlu0 %984, %v212_v14  }
  0x7e   : > { %501 = vperm.xlu1 %981, %v215_v18  }
  0x81   : > { %986 = vset.pattern.permute.xlu0 %v1169_v29 }
  0x82   : > { %983 = vset.pattern.permute.xlu1 %v1169_v29  ;;  %405 = vperm.xlu0 %986, %v214_v17  }
  0x83   : > { %397 = vperm.xlu1 %983, %v212_v14  }
  0x86   : > { %988 = vset.pattern.permute.xlu0 %v1168_v28 }
  0x87   : > { %401 = vperm.xlu1 %983, %v213_v15   ;;  %433 = vperm.xlu0 %988, %v215_v18  }
  0x8b   : > { %985 = vset.pattern.permute.xlu1 %v1168_v28  ;;  %989 = vset.pattern.permute.xlu0 %v1166_v23 }
  0x8c   : > { %425 = vperm.xlu1 %985, %v213_v15  }
  0x90   : > { %429 = vperm.xlu1 %985, %v214_v17  }
  0x94   : > { %987 = vset.pattern.permute.xlu1 %v1169_v29 }
  0x95   : > { %409 = vperm.xlu1 %987, %v215_v18  }
  0xda   : > { %v359_v31 = vpop.permute.xlu1 %358  ;;  %v316_v33 = vpop.permute.xlu0 %315 }
  0xde   : > { %v363_v32 = vpop.permute.xlu1 %362  ;;  %v321_v38 = vpop.permute.xlu0 %320 }
  0xe2   : > { %v367_v34 = vpop.permute.xlu1 %366  ;;  %v326_v47 = vpop.permute.xlu0 %325 }
  0xe6   : > { %v371_v44 = vpop.permute.xlu1 %370  ;;  %v331_v1 = vpop.permute.xlu0 %330 }
  0xeb   : > { %v490_v57 = vpop.permute.xlu1 %489 }
  0xf0   : > { %v470_v6 = vpop.permute.xlu1 %469 }
  0xf4   : > { %v474_v17 = vpop.permute.xlu1 %473 }
 0x13b   : > { %v290_v35 = vpop.f32.mrb[0].mxu0 }
 0x13c   : > { %v309_v36 = vmul.f32 0.0625, %v290_v35  ;;  %v292_v37 = vpop.f32.mrb[1].mxu0 }
 0x13e   : > { %v333_v39 = vmul.f32 %v316_v33, %v309_v36  ;;  %v373_v41 = vmul.f32 %v359_v31, %v309_v36 }
 0x13f   : > { %v295_v40 = vpop.f32.mrb[2].mxu0 }
 0x140   : > { %v310_v42 = vmul.f32 0.0625, %v295_v40  ;;  %v297_v43 = vpop.f32.mrb[3].mxu0  ;;  %v338_v48 = vsel %vm337_vm0, %v333_v39, 0.0  ;;  %v377_v50 = vsel %vm337_vm0, %v373_v41, 0.0  ;;  %v466_v40 = vpop.permute.xlu0 %465 }
 0x142   : > { %v334_v45 = vmul.f32 %v321_v38, %v310_v42  ;;  %v374_v46 = vmul.f32 %v363_v32, %v310_v42  ;;  %v498_v32 = vpop.permute.xlu1 %497 }
 0x143   : > { %v300_v49 = vpop.f32.mrb[4].mxu0 }
 0x144   : > { %v339_v51 = vsel %vm337_vm0, %v334_v45, 0.0  ;;  %v378_v52 = vsel %vm337_vm0, %v374_v46, 0.0  ;;  %v311_v53 = vmul.f32 0.0625, %v300_v49  ;;  %v302_v54 = vpop.f32.mrb[5].mxu0  ;;  %v494_v42 = vpop.permute.xlu0 %493 }
 0x145   : > { %v340_v55 = vadd.f32 %v339_v51, %v338_v48  ;;  %v379_v56 = vadd.f32 %v378_v52, %v377_v50 }
 0x146   : > { %v335_v58 = vmul.f32 %v326_v47, %v311_v53  ;;  %v375_v59 = vmul.f32 %v367_v34, %v311_v53  ;;  %v502_v39 = vpop.permute.xlu1 %501 }
 0x147   : > { %v305_v60 = vpop.f32.mrb[6].mxu0 }
 0x148   : > { %v341_v61 = vsel %vm337_vm0, %v335_v58, 0.0  ;;  %v380_v62 = vsel %vm337_vm0, %v375_v59, 0.0  ;;  %v312_v63 = vmul.f32 0.0625, %v305_v60  ;;  %v307_v0 = vpop.f32.mrb[7].mxu0  ;;  %v478_v48 = vpop.permute.xlu0 %477 }
 0x149   : > { %v342_v2 = vadd.f32 %v341_v61, %v340_v55  ;;  %v381_v3 = vadd.f32 %v380_v62, %v379_v56 }
 0x14a   : > { %v336_v4 = vmul.f32 %v331_v1, %v312_v63  ;;  %v376_v5 = vmul.f32 %v371_v44, %v312_v63  ;;  %v398_v41 = vpop.permute.xlu1 %397 }
 0x14c   : > { %v343_v7 = vsel %vm337_vm0, %v336_v4, 0.0  ;;  %v382_v8 = vsel %vm337_vm0, %v376_v5, 0.0  ;;  %v422_v50 = vpop.permute.xlu0 %421 }
 0x14d   : > { %v344_v9 = vadd.f32 %v343_v7, %v342_v2  ;;  %v383_v10 = vadd.f32 %v382_v8, %v381_v3 }
 0x14e   : > { %v402_v44 = vpop.permute.xlu1 %401 }
 0x14f   : > { %v345_v12 = vrot.slane %v344_v9, 4  ;;  %v384_v13 = vrot.slane %v383_v10, 4 }
 0x150   : > { %v406_v55 = vpop.permute.xlu0 %405 }
 0x151   : > { %v346_v14 = vadd.f32 %v345_v12, %v344_v9  ;;  %v385_v15 = vadd.f32 %v384_v13, %v383_v10 }
 0x152   : > { %v426_v49 = vpop.permute.xlu1 %425 }
 0x153   : > { %v347_v18 = vrot.slane %v346_v14, 2  ;;  %v386_v23 = vrot.slane %v385_v15, 2 }
 0x155   : > { %v348_v24 = vadd.f32 %v347_v18, %v346_v14  ;;  %v387_v28 = vadd.f32 %v386_v23, %v385_v15 }
 0x156   : > { %v430_v51 = vpop.permute.xlu1 %429 }
 0x157   : > { %v349_v29 = vrot.slane %v348_v24, 1  ;;  %v388_v31 = vrot.slane %v387_v28, 1 }
 0x159   : > { %v350_v33 = vadd.f32 %v349_v29, %v348_v24  ;;  %v389_v34 = vadd.f32 %v388_v31, %v387_v28 }
 0x15a   : > { %v410_v7 = vpop.permute.xlu1 %409 }
 0x15b   : > { %v351_v35 = vsub.f32 0.0, %v350_v33  ;;  %v390_v36 = vsub.f32 0.0, %v389_v34 }
 0x15d   : > { %v352_v37 = vmul.f32 1.442695, %v351_v35  ;;  %v391_v38 = vmul.f32 1.442695, %v390_v36 }
 0x15f   : > { %990 = vpow2.f32 %v352_v37 }
 0x160   : > { %992 = vpow2.f32 %v391_v38 }
 0x169   : > { %v991_v43 = vpop.eup %990 }
 0x16a   : > { %v993_v45 = vpop.eup %992  ;;  %v354_v46 = vadd.f32 1.0, %v991_v43 }
 0x16b   : > { %v393_v47 = vadd.f32 1.0, %v993_v45 }
 0x16c   : > { %994 = vrcp.f32 %v354_v46 }
 0x16d   : > { %996 = vrcp.f32 %v393_v47 }
 0x176   : > { %v995_v52 = vpop.eup %994 }
 0x177   : > { %v997_v53 = vpop.eup %996  ;;  %v356_v54 = vmul.f32 %v995_v52, %v350_v33 }
 0x178   : > { %v395_v56 = vmul.f32 %v997_v53, %v389_v34 }
 0x179   : > { %v481_v58 = vmul.f32 %v470_v6, %v356_v54  ;;  %v482_v59 = vmul.f32 %v474_v17, %v356_v54  ;;  %v480_v60 = vmul.f32 %v466_v40, %v356_v54  ;;  %v412_v61 = vmul.f32 %v398_v41, %v356_v54  ;;  %v434_v17 = vpop.permute.xlu0 %433 }
 0x17a   : > { %v504_v62 = vmul.f32 %v490_v57, %v395_v56  ;;  %v506_v63 = vmul.f32 %v498_v32, %v395_v56  ;;  %v507_v0 = vmul.f32 %v502_v39, %v395_v56  ;;  %v505_v1 = vmul.f32 %v494_v42, %v395_v56 }
 0x17b   : > { %v413_v2 = vmul.f32 %v402_v44, %v356_v54  ;;  %v483_v3 = vmul.f32 %v478_v48, %v356_v54  ;;  %v437_v4 = vmul.f32 %v426_v49, %v395_v56  ;;  %v436_v5 = vmul.f32 %v422_v50, %v395_v56 }
 0x17c   : > { %v510_v8 = vadd.f32 %v506_v63, %v482_v59  ;;  %v508_v9 = vadd.f32 %v504_v62, %v480_v60  ;;  %v509_v10 = vadd.f32 %v505_v1, %v481_v58  ;;  %v438_v12 = vmul.f32 %v430_v51, %v395_v56 }
 0x17d   : > { %v511_v13 = vadd.f32 %v507_v0, %v483_v3  ;;  %v441_v14 = vadd.f32 %v437_v4, %v413_v2  ;;  %v440_v15 = vadd.f32 %v436_v5, %v412_v61  ;;  %v414_v6 = vmul.f32 %v406_v55, %v356_v54 }
 0x17e   : > { %v514_v18 = vsub.f32 0.0, %v510_v8  ;;  %v512_v23 = vsub.f32 0.0, %v508_v9  ;;  %v513_v57 = vsub.f32 0.0, %v509_v10  ;;  %v415_v24 = vmul.f32 %v410_v7, %v356_v54 }
 0x17f   : > { %v515_v28 = vsub.f32 0.0, %v511_v13  ;;  %v445_v29 = vsub.f32 0.0, %v441_v14  ;;  %v444_v31 = vsub.f32 0.0, %v440_v15  ;;  %v442_v32 = vadd.f32 %v438_v12, %v414_v6 }
 0x180   : > { %v520_v33 = vmul.f32 1.442695, %v514_v18  ;;  %v516_v34 = vmul.f32 1.442695, %v512_v23  ;;  %v518_v35 = vmul.f32 1.442695, %v513_v57  ;;  %v439_v36 = vmul.f32 %v434_v17, %v395_v56 }
 0x181   : > { %v522_v37 = vmul.f32 1.442695, %v515_v28  ;;  %v450_v38 = vmul.f32 1.442695, %v445_v29  ;;  %v448_v40 = vmul.f32 1.442695, %v444_v31 }
 0x182   : > { %998 = vpow2.f32 %v520_v33  ;;  %v443_v39 = vadd.f32 %v439_v36, %v415_v24  ;;  %v446_v41 = vsub.f32 0.0, %v442_v32 }
 0x183   : > { %1000 = vpow2.f32 %v516_v34 }
 0x184   : > { %1002 = vpow2.f32 %v518_v35  ;;  %v447_v42 = vsub.f32 0.0, %v443_v39  ;;  %v452_v43 = vmul.f32 1.442695, %v446_v41 }
 0x185   : > { %1004 = vpow2.f32 %v522_v37 }
 0x186   : > { %1006 = vpow2.f32 %v450_v38  ;;  %v454_v44 = vmul.f32 1.442695, %v447_v42 }
 0x187   : > { %1008 = vpow2.f32 %v448_v40 }
 0x188   : > { %1010 = vpow2.f32 %v452_v43 }
 0x189   : > { %1012 = vpow2.f32 %v454_v44 }
 0x18c   : > { %v999_v45 = vpop.eup %998 }
 0x18d   : > { %v1001_v46 = vpop.eup %1000  ;;  %v526_v47 = vadd.f32 1.0, %v999_v45 }
 0x18e   : > { %v1003_v48 = vpop.eup %1002  ;;  %v524_v49 = vadd.f32 1.0, %v1001_v46 }
 0x18f   : > { %v1005_v50 = vpop.eup %1004  ;;  %1014 = vrcp.f32 %v526_v47  ;;  %v525_v51 = vadd.f32 1.0, %v1003_v48 }
 0x190   : > { %v1007_v52 = vpop.eup %1006  ;;  %1016 = vrcp.f32 %v524_v49  ;;  %v527_v55 = vadd.f32 1.0, %v1005_v50 }
 0x191   : > { %v1009_v53 = vpop.eup %1008  ;;  %1018 = vrcp.f32 %v525_v51  ;;  %v457_v56 = vadd.f32 1.0, %v1007_v52 }
 0x192   : > { %v456_v54 = vadd.f32 1.0, %v1009_v53  ;;  %v1011_v58 = vpop.eup %1010 }
 0x193   : > { %v1013_v59 = vpop.eup %1012  ;;  %v458_v60 = vadd.f32 1.0, %v1011_v58 }
 0x194   : > { %1020 = vrcp.f32 %v456_v54  ;;  %v459_v63 = vadd.f32 1.0, %v1013_v59 }
 0x195   : > { %1022 = vrcp.f32 %v527_v55 }
 0x196   : > { %1024 = vrcp.f32 %v457_v56 }
 0x197   : > { %1026 = vrcp.f32 %v458_v60 }
 0x198   : > { %1028 = vrcp.f32 %v459_v63 }
 0x199   : > { %v1015_v61 = vpop.eup %1014 }
 0x19a   : > { %v1017_v62 = vpop.eup %1016  ;;  %642 = vrot.lane.b32.xlu0 %v1015_v61, %s1171_s27 }
 0x19b   : > { %638 = vrot.lane.b32.xlu1 %v1017_v62, %s1171_s27  ;;  %v1019_v0 = vpop.eup %1018 }
 0x19e   : > { %v1021_v1 = vpop.eup %1020 }
 0x19f   : > { %875 = vmatmul.mubr.msk.f32.vlgmr.msra.gmra.mrb[0].mxu1 %vm532_vm1, %v1021_v1  ;;  %640 = vrot.lane.b32.xlu1 %v1019_v0, %s1171_s27  ;;  %v1023_v2 = vpop.eup %1022 }
 0x1a0   : > { %615 = vmatprep.mubr.f32.mxu1 %v1170_v30  ;;  %905 = vmatpush1.bf16.msra.mxu1 %v1366_v16  ;;  %v1025_v3 = vpop.eup %1024 }
 0x1a1   : > { %v1027_v4 = vpop.eup %1026 }
 0x1a2   : > { %v1029_v5 = vpop.eup %1028 }
 0x1a3   : > { %876 = vmatmul.mubr.msk.f32.gmra.mrb[2].mxu1 %vm532_vm1, %v1025_v3  ;;  %644 = vrot.lane.b32.xlu1 %v1023_v2, %s1171_s27 }
 0x1a4   : > { %621 = vmatprep.mubr.f32.mxu1 %v1170_v30 }
 0x1a7   : > { %877 = vmatmul.mubr.msk.f32.gmra.mrb[4].mxu1 %vm532_vm1, %v1027_v4 }
 0x1a8   : > { %627 = vmatprep.mubr.f32.mxu1 %v1170_v30 }
 0x1ab   : > { %878 = vmatmul.mubr.msk.f32.gmra.mrb[6].mxu1 %vm532_vm1, %v1029_v5 }
 0x1ac   : > { %718 = vmatprep.mubr.f32.mxu1 %v1170_v30 }
 0x20c   : > { %v643_v8 = vpop.permute.xlu0 %642 }
 0x20d   : > { %v639_v7 = vpop.permute.xlu1 %638 }
 0x20e   : > { %879 = vmatmul.mubr.msk.f32.vlgmr.msra.gmra.mrb[8].mxu1 %vm532_vm1, %v639_v7 }
 0x20f   : > { %724 = vmatprep.mubr.f32.mxu1 %v1170_v30 }
 0x211   : > { %v641_v16 = vpop.permute.xlu1 %640 }
 0x212   : > { %880 = vmatmul.mubr.msk.f32.gmra.mrb[10].mxu1 %vm532_vm1, %v641_v16 }
 0x213   : > { %730 = vmatprep.mubr.f32.mxu1 %v1170_v30 }
 0x215   : > { %v645_v9 = vpop.permute.xlu1 %644 }
 0x216   : > { %881 = vmatmul.mubr.msk.f32.gmra.mrb[12].mxu1 %vm532_vm1, %v643_v8 }
 0x217   : > { %736 = vmatprep.mubr.f32.mxu1 %v1170_v30 }
 0x21a   : > { %882 = vmatmul.mubr.msk.f32.gmra.mrb[14].mxu1 %vm532_vm1, %v645_v9 }
 0x272   : > { %v611_v10 = vpop.f32.mrb[0].mxu1 }
 0x273   : > { %v613_v12 = vpop.f32.mrb[1].mxu1  ;;  %v743_v23 = vmul.f32 %v611_v10, %v1376_v19 }
 0x274   : > { %v744_v57 = vmul.f32 %v613_v12, %v1357_v11 }
 0x276   : > { %v617_v13 = vpop.f32.mrb[2].mxu1 }
 0x277   : > { %v619_v14 = vpop.f32.mrb[3].mxu1  ;;  %v745_v31 = vmul.f32 %v617_v13, %v1384_v21 }
 0x278   : > { %v746_v32 = vmul.f32 %v619_v14, %v1379_v20 }
 0x27a   : > { %v623_v15 = vpop.f32.mrb[4].mxu1 }
 0x27b   : > { %v625_v6 = vpop.f32.mrb[5].mxu1  ;;  %v747_v19 = vmul.f32 %v623_v15, %v1392_v25 }
 0x27c   : > { %v748_v11 = vmul.f32 %v625_v6, %v1387_v22 }
 0x27e   : > { %v629_v17 = vpop.f32.mrb[6].mxu1 }
 0x27f   : > { %v631_v18 = vpop.f32.mrb[7].mxu1  ;;  %v749_v20 = vmul.f32 %v629_v17, %v1400_v27 }
 0x280   : > { %v750_v40 = vmul.f32 %v631_v18, %v1395_v26 }
 0x2e1   : > { %v720_v24 = vpop.f32.mrb[8].mxu1 }
 0x2e2   : > { %v751_v28 = vmul.f32 %v743_v23, %v720_v24  ;;  %v722_v29 = vpop.f32.mrb[9].mxu1 }
 0x2e3   : > { %v752_v30 = vmul.f32 %v744_v57, %v722_v29 }
 0x2e4   : > { %759 = vst [vmem:[%s203_s28] sm:$0xff] %v751_v28 }
 0x2e5   : > { %760 = vst [vmem:[%s203_s28 + $0x8] sm:$0xff] %v752_v30  ;;  %v726_v33 = vpop.f32.mrb[10].mxu1 }
 0x2e6   : > { %v753_v34 = vmul.f32 %v745_v31, %v726_v33  ;;  %v728_v35 = vpop.f32.mrb[11].mxu1 }
 0x2e7   : > { %v754_v36 = vmul.f32 %v746_v32, %v728_v35 }
 0x2e8   : > { %761 = vst [vmem:[%s203_s28 + $0x10] sm:$0xff] %v753_v34 }
 0x2e9   : > { %762 = vst [vmem:[%s203_s28 + $0x18] sm:$0xff] %v754_v36  ;;  %v732_v37 = vpop.f32.mrb[12].mxu1 }
 0x2ea   : > { %v755_v21 = vmul.f32 %v747_v19, %v732_v37  ;;  %v734_v38 = vpop.f32.mrb[13].mxu1 }
 0x2eb   : > { %v756_v39 = vmul.f32 %v748_v11, %v734_v38 }
 0x2ec   : > { %763 = vst [vmem:[%s203_s28 + $0x20] sm:$0xff] %v755_v21 }
 0x2ed   : > { %764 = vst [vmem:[%s203_s28 + $0x28] sm:$0xff] %v756_v39  ;;  %v738_v22 = vpop.f32.mrb[14].mxu1 }
 0x2ee   : > { %v757_v25 = vmul.f32 %v749_v20, %v738_v22  ;;  %v740_v41 = vpop.f32.mrb[15].mxu1 }
 0x2ef   : > { %v758_v42 = vmul.f32 %v750_v40, %v740_v41 }
 0x2f0   : > { %765 = vst [vmem:[%s203_s28 + $0x30] sm:$0xff] %v757_v25 }
 0x2f1   : > { %766 = vst [vmem:[%s203_s28 + $0x38] sm:$0xff] %v758_v42 }
 0x2f2   : > { %1101 = shalt.err (!%p1098_p7)
}
 0x2f3   : > { %s1102_s8 = scalar_lea.hbm %s1444_s7, 1024  ;;  %s1106_s25 = scalar_lea.hbm %s1491_s3, 2048 }
 0x2f4   : > { %p1103_p9 = scmp.ne.s32.totalorder %s1444_s7, %s1102_s8  ;;  %p1107_p5 = scmp.lt.u32.totalorder %s1444_s7, %s1491_s3 }
 0x2f5   : > { %p1108_p11 = scmp.lt.u32.totalorder %s1106_s25, %s1102_s8  ;;  %p1110_p4 = scmp.lt.u32.totalorder %s1102_s8, %s1444_s7 }
 0x2f6   : > { %p1104_p1 = pnand %p1103_p9, %p1289_p12 }
 0x2f7   : > { %p1109_p2 = por %p1108_p11, %p1107_p5 }
 0x2f8   : > { %p1105_p0 = pneg %p1104_p1 }
 0x2f9   : > { %p1111_p6 = por %p1110_p4, %p1109_p2 }
 0x2fb   : > { %p1112_p8 = pnand %p1111_p6, %p1105_p0 }
 0x2fd   : > { %1115 = shalt.err (!%p1112_p8)
}
 0x2fe   : > { %s1173_s27 = smov 256   ;;  %s1174_s28 = smov 16  }
 0x2ff   : > { %912 = dma.vmem_to_hbm [thread:$0]  (%p1289_p12), %s1439_s23, 1024, %s1444_s7, %s768_s16, %s1173_s27, %s1173_s27, %s1174_s28  }
 0x300 PF: > { %s796_s29 = sand.u32 1, %s1146_s12   ;;  %p1506_p10 = scmp.ne.s32.totalorder %s1496_s19, 0 }
 0x301   : > { %p1507_p13 = scmp.ge.s32.totalorder %s1158_s15, 2  ;;  %s797_s30 = scalar_lea.sflag [#allocation4], %s796_s29 }
 0x303   : > { %p923_p3 = pnand %p1507_p13, %p1506_p10 }
 0x305   : > { %1141 = dma.done.wait (!%p923_p3), %s797_s30, 1024  }
 0x306   : > { %1143 = vsyncadd (!%p923_p3), %s797_s30, 4294966272  ;;  %p17_p7 = scmp.ge.s32.totalorder %s1251_s24, 4   ;;  %s1508_s12 = smov %s1150_s13 }
 0x307   : > { %s1509_s13 = smov %s1154_s14  ;;  %s1510_s14 = smov %s1285_s17 }
 0x308   : > { %s1511_s15 = smov %s1251_s24  ;;  %19 = sbr.rel (!%p17_p7) target bundleno = 6 (0x6), region = 81 }
 0x30f   :  { %802 = vsyncpa [#allocation3], 1 }
 0x310   :  { %804 = vsyncpa [#allocation3 + $0x1], 1 }
 0x311   :  { %805 = vsyncpa [#allocation6], 1 }
 0x312   :  { %806 = vsyncpa [#allocation4], 1 }
 0x313   :  { %808 = vsyncpa [#allocation4 + $0x1], 1 }

</bundles_post_ra>
